<compile_context>
chip_gen: v7x
topology: tpu7x:2x2x1
jax: 0.10.0
libtpu: 0.0.40
codegen_flags: <defaults>
</compile_context>

<pallas_src>
import jax
import jax.numpy as jnp
import numpy as np
from jax.experimental import pallas as pl
from jax.experimental.pallas import tpu as pltpu


def _round_up(x: int, m: int) -> int:
    return ((x + m - 1) // m) * m


def _vmem_capacity_bytes() -> int:
    try:
        return int(pltpu.get_tpu_info().vmem_capacity_bytes)
    except Exception:
        return 64 << 20  # conservative per-core fallback (v7x)


def _default_min_batch_tiles() -> int:
    # v7x has 2 TensorCores per chip: want >= 2 batch tiles so the "parallel" axis shards.
    try:
        kind = (jax.devices()[0].device_kind or "").lower()
        return 2 if "v7" in kind else 1
    except Exception:
        return 1


def _choose_batch_tiling(B: int, min_tiles: int):
    """Return (B_pad, tile_b): 8-aligned tile_b <= 1024, B_pad a multiple of tile_b."""
    TILE_CAP = 1024  # v6e needs ~700+ rows/tile to hide the streamed w_r HBM traffic
    B8 = max(8, _round_up(B, 8))
    tile = min(TILE_CAP, B8)
    if min_tiles > 1 and B8 >= 8 * min_tiles:
        tile = min(tile, _round_up((B8 + min_tiles - 1) // min_tiles, 8))
    tile = max(8, (tile // 8) * 8)
    return _round_up(B8, tile), tile


def _simplex_kernel(x_ref, w_in_ref, b_in_ref, w_r_ref, b_r_ref,
                    w_out_ref, b_out_ref, g_ref, gt_ref, out_ref, h_ref):
    l = pl.program_id(1)
    n_layers = pl.num_programs(1)

    # ---- l == 0: input projection + ReLU into the resident h accumulator ------------
    @pl.when(l == 0)
    def _():
        h0 = jnp.dot(x_ref[...], w_in_ref[...], preferred_element_type=jnp.float32)
        h_ref[...] = jnp.maximum(h0 + b_in_ref[...], 0.0)

    # ---- residual simplex block for layer l (w_r / b_r are pre-scaled by 1/tau) -----
    h = h_ref[...]
    z = (jnp.dot(h.astype(jnp.bfloat16), w_r_ref[...],
                 preferred_element_type=jnp.float32) + b_r_ref[...])

    # Grouped softmax. The shift uses the per-row max: exact per group (shift invariance)
    # and numerically safe while the per-row spread of z/tau stays well below ~80. The
    # clamp keeps a fully-underflowed group at 0 instead of NaN/Inf.
    s = z - jnp.max(z, axis=-1, keepdims=True)
    e = jnp.exp(s)
    group_sum = jnp.dot(e.astype(jnp.bfloat16), g_ref[...],
                        preferred_element_type=jnp.float32)              # (TB, R/8)
    inv_gs = pl.reciprocal(jnp.maximum(group_sum, 1e-30), approx=True)   # EUP
    inv_denom = jnp.dot(inv_gs.astype(jnp.bfloat16), gt_ref[...],
                        preferred_element_type=jnp.float32)              # (TB, R)
    h_new = e * inv_denom + h
    h_ref[...] = h_new

    # ---- l == last: output projection (lane-padded -> dense store) -------------------
    @pl.when(l == n_layers - 1)
    def _():
        out_ref[...] = (jnp.dot(h_new.astype(jnp.bfloat16), w_out_ref[...],
                                preferred_element_type=jnp.float32) + b_out_ref[...])


def simplex_model_pallas(x, params, *, resid_count: int, tau: float,
                         partition_dim: int = 8, tile_b=None, min_batch_tiles=None):
    assert resid_count >= 1, "kernel expects at least one residual layer"
    w_in, b_in, w_r, b_r, w_out, b_out = params
    B, input_dim = x.shape
    R = w_in.shape[1]
    out_dim = w_out.shape[1]
    assert R % partition_dim == 0
    n_groups = R // partition_dim

    if min_batch_tiles is None:
        min_batch_tiles = _default_min_batch_tiles()
    if tile_b is None:
        B_pad, tile_b = _choose_batch_tiling(B, min_batch_tiles)
    else:
        assert tile_b % 8 == 0
        B_pad = _round_up(max(B, tile_b), tile_b)

    # Lane-dense output: pad the output projection to a multiple of 128 lanes.
    out_pad = max(128, _round_up(out_dim, 128))

    # Host-side constant prep: bf16 weights for the MXU, fold 1/tau into the residual layer.
    w_in_k = w_in.astype(jnp.bfloat16)
    b_in_k = b_in.astype(jnp.float32)
    w_r_k = (w_r / tau).astype(jnp.bfloat16)
    b_r_k = (b_r / tau).astype(jnp.float32)
    w_out_k = jnp.zeros((R, out_pad), jnp.bfloat16).at[:, :out_dim].set(
        w_out.astype(jnp.bfloat16))
    b_out_k = jnp.zeros((1, out_pad), jnp.float32).at[:, :out_dim].set(
        b_out.astype(jnp.float32))

    # Group-membership matrices (hoisted out of the kernel, resident bf16 constants).
    feat_group = np.arange(R) // partition_dim
    g_np = (feat_group[:, None] == np.arange(n_groups)[None, :]).astype(np.float32)
    g_mat = jnp.asarray(g_np, dtype=jnp.bfloat16)          # (R, R/8)
    gt_mat = jnp.asarray(g_np.T, dtype=jnp.bfloat16)       # (R/8, R)

    # x: bf16 into the kernel (it is consumed as a bf16 matmul operand anyway); pad batch.
    x_k = x.astype(jnp.bfloat16)
    if B_pad != B:
        x_k = jnp.zeros((B_pad, input_dim), jnp.bfloat16).at[:B].set(x_k)

    grid = (B_pad // tile_b, resid_count)

    # VMEM budget: counted double buffers + resident weights + h scratch, 80% cap of capacity.
    est = (2 * tile_b * input_dim * 2                     # x tile (bf16)
           + 2 * tile_b * out_pad * 4                     # out tile (f32)
           + 2 * (R * R * 2 + R * 4)                      # streamed w_r (bf16) + b_r (f32)
           + 2 * (input_dim * R + R * out_pad) * 2        # resident w_in / w_out (bf16)
           + 2 * (R + out_pad) * 4                        # resident biases (f32)
           + 2 * 2 * (R * n_groups) * 2                   # resident G / G^T (bf16)
           + tile_b * R * 4)                              # h scratch (f32)
    vmem_cap = _vmem_capacity_bytes()
    vmem_limit = int(min(max(est + (4 << 20), 32 << 20), (vmem_cap * 4) // 5))

    out_padded = pl.pallas_call(
        _simplex_kernel,
        out_shape=jax.ShapeDtypeStruct((B_pad, out_pad), jnp.float32),
        grid_spec=pltpu.PrefetchScalarGridSpec(
            num_scalar_prefetch=0,
            grid=grid,
            in_specs=[
                pl.BlockSpec((tile_b, input_dim), lambda b, l: (b, 0)),   # x (revisited)
                pl.BlockSpec((input_dim, R), lambda b, l: (0, 0)),        # w_in (resident)
                pl.BlockSpec((1, R), lambda b, l: (0, 0)),                # b_in
                pl.BlockSpec((None, R, R), lambda b, l: (l, 0, 0)),       # w_r[l] (streamed)
                pl.BlockSpec((None, 1, R), lambda b, l: (l, 0, 0)),       # b_r[l] (streamed)
                pl.BlockSpec((R, out_pad), lambda b, l: (0, 0)),          # w_out (padded)
                pl.BlockSpec((1, out_pad), lambda b, l: (0, 0)),          # b_out (padded)
                pl.BlockSpec((R, n_groups), lambda b, l: (0, 0)),         # G (resident)
                pl.BlockSpec((n_groups, R), lambda b, l: (0, 0)),         # G^T (resident)
            ],
            out_specs=pl.BlockSpec((tile_b, out_pad), lambda b, l: (b, 0)),
            scratch_shapes=[pltpu.VMEM((tile_b, R), jnp.float32)],
        ),
        compiler_params=pltpu.CompilerParams(
            dimension_semantics=("parallel", "arbitrary"),
            vmem_limit_bytes=vmem_limit),
    )(x_k, w_in_k, b_in_k, w_r_k, b_r_k, w_out_k, b_out_k, g_mat, gt_mat)

    return out_padded[:B, :out_dim]


def init_params(key, input_dim, resid_dim, resid_count, output_dim):
    # Deterministic, PyTorch-Linear-like uniform init; weights stored (in, out), all f32.
    def linear(k, fan_in, fan_out):
        k1, k2 = jax.random.split(k)
        bound = 1.0 / np.sqrt(fan_in)
        w = jax.random.uniform(k1, (fan_in, fan_out), jnp.float32, -bound, bound)
        b = jax.random.uniform(k2, (1, fan_out), jnp.float32, -bound, bound)
        return w, b

    keys = jax.random.split(key, resid_count + 2)
    w_in, b_in = linear(keys[0], input_dim, resid_dim)
    w_rs, b_rs = [], []
    for i in range(resid_count):
        w, b = linear(keys[1 + i], resid_dim, resid_dim)
        w_rs.append(w)
        b_rs.append(b)
    w_r = jnp.stack(w_rs, axis=0)            # (L, R, R)
    b_r = jnp.stack(b_rs, axis=0)            # (L, 1, R)
    w_out, b_out = linear(keys[-1], resid_dim, output_dim)
    return w_in, b_in, w_r, b_r, w_out, b_out


def reference_forward(x, params, *, resid_count, tau, partition_dim=8):
    # Pure-JAX f32 reference matching the PyTorch module semantics.
    w_in, b_in, w_r, b_r, w_out, b_out = params
    B = x.shape[0]
    R = w_in.shape[1]
    h = jnp.maximum(x @ w_in + b_in, 0.0)
    for l in range(resid_count):
        z = h @ w_r[l] + b_r[l]
        zg = z.reshape(B, R // partition_dim, partition_dim)
        a = jax.nn.softmax(zg / tau, axis=-1).reshape(B, R)
        h = a + h
    return h @ w_out + b_out


if __name__ == "__main__":
    # Small shapes consistent with the module.
    input_dim, resid_dim, resid_count, output_dim, tau = 16, 32, 3, 8, 10.0
    batch = 8

    # Mirror SimplexModel's resid_dim adjustment (must be a multiple of 8).
    if resid_dim % 8 != 0:
        resid_dim = int(resid_dim / 8) * 8

    key = jax.random.PRNGKey(0)
    k_param, k_x = jax.random.split(key)
    params = init_params(k_param, input_dim, resid_dim, resid_count, output_dim)
    x = jax.random.normal(k_x, (batch, input_dim), jnp.float32)

    out = simplex_model_pallas(x, params, resid_count=resid_count, tau=tau)
    out = jax.block_until_ready(out)

    ref = reference_forward(x, params, resid_count=resid_count, tau=tau)
    # Tolerance loosened vs a pure-f32 variant: matmul operands are bf16 (f32 accumulation)
    # and the softmax denominator uses the EUP approx reciprocal.
    np.testing.assert_allclose(np.asarray(out), np.asarray(ref), rtol=2e-2, atol=2e-2)

    print("KERNEL_OK")
</pallas_src>

<mosaic_0001>
module attributes {stable_mosaic.version = 11 : i64} {
  func.func @_simplex_kernel(%arg0: i32, %arg1: i32, %arg2: memref<8x16xbf16, #tpu.memory_space<vmem>>, %arg3: memref<16x32xbf16, #tpu.memory_space<vmem>>, %arg4: memref<1x32xf32, #tpu.memory_space<vmem>>, %arg5: memref<1x32x32xbf16, #tpu.memory_space<vmem>>, %arg6: memref<1x1x32xf32, #tpu.memory_space<vmem>>, %arg7: memref<32x128xbf16, #tpu.memory_space<vmem>>, %arg8: memref<1x128xf32, #tpu.memory_space<vmem>>, %arg9: memref<32x4xbf16, #tpu.memory_space<vmem>>, %arg10: memref<4x32xbf16, #tpu.memory_space<vmem>>, %arg11: memref<8x128xf32, #tpu.memory_space<vmem>>, %arg12: memref<8x32xf32, #tpu.memory_space<vmem>>) attributes {dimension_semantics = [#tpu.dimension_semantics<parallel>, #tpu.dimension_semantics<arbitrary>], iteration_bounds = array<i64: 1, 3>, scalar_prefetch = 0 : i64, scratch_operands = 1 : i64, tpu.core_type = #tpu.core_type<tc>, window_params = [{transform_indices = @transform_0, window_bounds = array<i64: 8, 16>}, {pipeline_mode = #tpu.pipeline_mode<synchronous>, transform_indices = @transform_1, window_bounds = array<i64: 16, 32>}, {pipeline_mode = #tpu.pipeline_mode<synchronous>, transform_indices = @transform_2, window_bounds = array<i64: 1, 32>}, {transform_indices = @transform_3, window_bounds = array<i64: 1, 32, 32>}, {transform_indices = @transform_4, window_bounds = array<i64: 1, 1, 32>}, {pipeline_mode = #tpu.pipeline_mode<synchronous>, transform_indices = @transform_5, window_bounds = array<i64: 32, 128>}, {pipeline_mode = #tpu.pipeline_mode<synchronous>, transform_indices = @transform_6, window_bounds = array<i64: 1, 128>}, {pipeline_mode = #tpu.pipeline_mode<synchronous>, transform_indices = @transform_7, window_bounds = array<i64: 32, 4>}, {pipeline_mode = #tpu.pipeline_mode<synchronous>, transform_indices = @transform_8, window_bounds = array<i64: 4, 32>}, {transform_indices = @transform_9, window_bounds = array<i64: 8, 128>}]} {
    %c0_i32 = arith.constant 0 : i32
    %0 = arith.cmpi eq, %arg1, %c0_i32 : i32
    %1 = arith.extui %0 : i1 to i32
    %c0_i32_0 = arith.constant 0 : i32
    %2 = arith.cmpi ne, %1, %c0_i32_0 : i32
    scf.if %2 {
      %c0_19 = arith.constant 0 : index
      %c0_20 = arith.constant 0 : index
      %32 = vector.load %arg2[%c0_19, %c0_20] : memref<8x16xbf16, #tpu.memory_space<vmem>>, vector<8x16xbf16>
      %c0_21 = arith.constant 0 : index
      %c0_22 = arith.constant 0 : index
      %33 = vector.load %arg3[%c0_21, %c0_22] : memref<16x32xbf16, #tpu.memory_space<vmem>>, vector<16x32xbf16>
      %cst_23 = arith.constant dense<0.000000e+00> : vector<8x32xf32>
      %34 = tpu.matmul %32, %33, %cst_23 {dimension_numbers = #tpu.dot_dimension_numbers<[1], [0], [0], [1], [0, 0, 1, 1], [], []>} : vector<8x16xbf16>, vector<16x32xbf16>, vector<8x32xf32> -> vector<8x32xf32>
      %c0_24 = arith.constant 0 : index
      %c0_25 = arith.constant 0 : index
      %35 = vector.load %arg4[%c0_24, %c0_25] : memref<1x32xf32, #tpu.memory_space<vmem>>, vector<1x32xf32>
      %36 = vector.broadcast %35 : vector<1x32xf32> to vector<8x32xf32>
      %37 = arith.addf %34, %36 : vector<8x32xf32>
      %cst_26 = arith.constant 0.000000e+00 : f32
      %38 = vector.broadcast %cst_26 : f32 to vector<8x32xf32>
      %39 = arith.maximumf %37, %38 : vector<8x32xf32>
      %c0_27 = arith.constant 0 : index
      %c0_28 = arith.constant 0 : index
      %40 = vector.load %arg12[%c0_27, %c0_28] : memref<8x32xf32, #tpu.memory_space<vmem>>, vector<8x32xf32>
      tpu.vector_store %arg12[%c0_27, %c0_28], %39 {strides = array<i32>} : memref<8x32xf32, #tpu.memory_space<vmem>>, vector<8x32xf32>,
    } else {
    }
    %c0 = arith.constant 0 : index
    %c0_1 = arith.constant 0 : index
    %3 = vector.load %arg12[%c0, %c0_1] : memref<8x32xf32, #tpu.memory_space<vmem>>, vector<8x32xf32>
    %4 = arith.truncf %3 : vector<8x32xf32> to vector<8x32xbf16>
    %c0_2 = arith.constant 0 : index
    %c0_3 = arith.constant 0 : index
    %c0_4 = arith.constant 0 : index
    %5 = vector.load %arg5[%c0_2, %c0_3, %c0_4] : memref<1x32x32xbf16, #tpu.memory_space<vmem>>, vector<1x32x32xbf16>
    %6 = vector.shape_cast %5 : vector<1x32x32xbf16> to vector<32x32xbf16>
    %cst = arith.constant dense<0.000000e+00> : vector<8x32xf32>
    %7 = tpu.matmul %4, %6, %cst {dimension_numbers = #tpu.dot_dimension_numbers<[1], [0], [0], [1], [0, 0, 1, 1], [], []>} : vector<8x32xbf16>, vector<32x32xbf16>, vector<8x32xf32> -> vector<8x32xf32>
    %c0_5 = arith.constant 0 : index
    %c0_6 = arith.constant 0 : index
    %c0_7 = arith.constant 0 : index
    %8 = vector.load %arg6[%c0_5, %c0_6, %c0_7] : memref<1x1x32xf32, #tpu.memory_space<vmem>>, vector<1x1x32xf32>
    %9 = vector.shape_cast %8 : vector<1x1x32xf32> to vector<1x32xf32>
    %10 = vector.broadcast %9 : vector<1x32xf32> to vector<8x32xf32>
    %11 = arith.addf %7, %10 : vector<8x32xf32>
    %cst_8 = arith.constant dense<0xFF800000> : vector<8xf32>
    %12 = vector.multi_reduction <maximumf>, %11, %cst_8 [1] : vector<8x32xf32> to vector<8xf32>
    %13 = vector.shape_cast %12 : vector<8xf32> to vector<8x1xf32>
    %14 = vector.broadcast %13 : vector<8x1xf32> to vector<8x32xf32>
    %15 = arith.subf %11, %14 : vector<8x32xf32>
    %16 = math.exp %15 : vector<8x32xf32>
    %17 = arith.truncf %16 : vector<8x32xf32> to vector<8x32xbf16>
    %c0_9 = arith.constant 0 : index
    %c0_10 = arith.constant 0 : index
    %18 = vector.load %arg9[%c0_9, %c0_10] : memref<32x4xbf16, #tpu.memory_space<vmem>>, vector<32x4xbf16>
    %cst_11 = arith.constant dense<0.000000e+00> : vector<8x4xf32>
    %19 = tpu.matmul %17, %18, %cst_11 {dimension_numbers = #tpu.dot_dimension_numbers<[1], [0], [0], [1], [0, 0, 1, 1], [], []>} : vector<8x32xbf16>, vector<32x4xbf16>, vector<8x4xf32> -> vector<8x4xf32>
    %cst_12 = arith.constant 1.000000e-30 : f32
    %20 = vector.broadcast %cst_12 : f32 to vector<8x4xf32>
    %21 = arith.maximumf %19, %20 : vector<8x4xf32>
    %22 = tpu.reciprocal %21 {approx = true} : vector<8x4xf32> -> vector<8x4xf32>
    %23 = arith.truncf %22 : vector<8x4xf32> to vector<8x4xbf16>
    %c0_13 = arith.constant 0 : index
    %c0_14 = arith.constant 0 : index
    %24 = vector.load %arg10[%c0_13, %c0_14] : memref<4x32xbf16, #tpu.memory_space<vmem>>, vector<4x32xbf16>
    %cst_15 = arith.constant dense<0.000000e+00> : vector<8x32xf32>
    %25 = tpu.matmul %23, %24, %cst_15 {dimension_numbers = #tpu.dot_dimension_numbers<[1], [0], [0], [1], [0, 0, 1, 1], [], []>} : vector<8x4xbf16>, vector<4x32xbf16>, vector<8x32xf32> -> vector<8x32xf32>
    %26 = arith.mulf %16, %25 : vector<8x32xf32>
    %27 = arith.addf %26, %3 : vector<8x32xf32>
    %c0_16 = arith.constant 0 : index
    %c0_17 = arith.constant 0 : index
    %28 = vector.load %arg12[%c0_16, %c0_17] : memref<8x32xf32, #tpu.memory_space<vmem>>, vector<8x32xf32>
    tpu.vector_store %arg12[%c0_16, %c0_17], %27 {strides = array<i32>} : memref<8x32xf32, #tpu.memory_space<vmem>>, vector<8x32xf32>,
    %c2_i32 = arith.constant 2 : i32
    %29 = arith.cmpi eq, %arg1, %c2_i32 : i32
    %30 = arith.extui %29 : i1 to i32
    %c0_i32_18 = arith.constant 0 : i32
    %31 = arith.cmpi ne, %30, %c0_i32_18 : i32
    scf.if %31 {
      %32 = arith.truncf %27 : vector<8x32xf32> to vector<8x32xbf16>
      %c0_19 = arith.constant 0 : index
      %c0_20 = arith.constant 0 : index
      %33 = vector.load %arg7[%c0_19, %c0_20] : memref<32x128xbf16, #tpu.memory_space<vmem>>, vector<32x128xbf16>
      %cst_21 = arith.constant dense<0.000000e+00> : vector<8x128xf32>
      %34 = tpu.matmul %32, %33, %cst_21 {dimension_numbers = #tpu.dot_dimension_numbers<[1], [0], [0], [1], [0, 0, 1, 1], [], []>} : vector<8x32xbf16>, vector<32x128xbf16>, vector<8x128xf32> -> vector<8x128xf32>
      %c0_22 = arith.constant 0 : index
      %c0_23 = arith.constant 0 : index
      %35 = vector.load %arg8[%c0_22, %c0_23] : memref<1x128xf32, #tpu.memory_space<vmem>>, vector<1x128xf32>
      %36 = vector.broadcast %35 : vector<1x128xf32> to vector<8x128xf32>
      %37 = arith.addf %34, %36 : vector<8x128xf32>
      %c0_24 = arith.constant 0 : index
      %c0_25 = arith.constant 0 : index
      %38 = vector.load %arg11[%c0_24, %c0_25] : memref<8x128xf32, #tpu.memory_space<vmem>>, vector<8x128xf32>
      tpu.vector_store %arg11[%c0_24, %c0_25], %37 {strides = array<i32>} : memref<8x128xf32, #tpu.memory_space<vmem>>, vector<8x128xf32>,
    } else {
    }
    return
  }
  func.func @transform_0(%arg0: i32, %arg1: i32) -> (i32, i32) {
    %c0_i32 = arith.constant 0 : i32
    %c0_i32_0 = arith.constant 0 : i32
    return %arg0, %c0_i32 : i32, i32
  }
  func.func @transform_1(%arg0: i32, %arg1: i32) -> (i32, i32) {
    %c0_i32 = arith.constant 0 : i32
    %c0_i32_0 = arith.constant 0 : i32
    %c0_i32_1 = arith.constant 0 : i32
    return %c0_i32, %c0_i32_0 : i32, i32
  }
  func.func @transform_2(%arg0: i32, %arg1: i32) -> (i32, i32) {
    %c0_i32 = arith.constant 0 : i32
    %c0_i32_0 = arith.constant 0 : i32
    %c0_i32_1 = arith.constant 0 : i32
    return %c0_i32, %c0_i32_0 : i32, i32
  }
  func.func @transform_3(%arg0: i32, %arg1: i32) -> (i32, i32, i32) {
    %c0_i32 = arith.constant 0 : i32
    %c0_i32_0 = arith.constant 0 : i32
    %c0_i32_1 = arith.constant 0 : i32
    return %arg1, %c0_i32, %c0_i32_0 : i32, i32, i32
  }
  func.func @transform_4(%arg0: i32, %arg1: i32) -> (i32, i32, i32) {
    %c0_i32 = arith.constant 0 : i32
    %c0_i32_0 = arith.constant 0 : i32
    %c0_i32_1 = arith.constant 0 : i32
    return %arg1, %c0_i32, %c0_i32_0 : i32, i32, i32
  }
  func.func @transform_5(%arg0: i32, %arg1: i32) -> (i32, i32) {
    %c0_i32 = arith.constant 0 : i32
    %c0_i32_0 = arith.constant 0 : i32
    %c0_i32_1 = arith.constant 0 : i32
    return %c0_i32, %c0_i32_0 : i32, i32
  }
  func.func @transform_6(%arg0: i32, %arg1: i32) -> (i32, i32) {
    %c0_i32 = arith.constant 0 : i32
    %c0_i32_0 = arith.constant 0 : i32
    %c0_i32_1 = arith.constant 0 : i32
    return %c0_i32, %c0_i32_0 : i32, i32
  }
  func.func @transform_7(%arg0: i32, %arg1: i32) -> (i32, i32) {
    %c0_i32 = arith.constant 0 : i32
    %c0_i32_0 = arith.constant 0 : i32
    %c0_i32_1 = arith.constant 0 : i32
    return %c0_i32, %c0_i32_0 : i32, i32
  }
  func.func @transform_8(%arg0: i32, %arg1: i32) -> (i32, i32) {
    %c0_i32 = arith.constant 0 : i32
    %c0_i32_0 = arith.constant 0 : i32
    %c0_i32_1 = arith.constant 0 : i32
    return %c0_i32, %c0_i32_0 : i32, i32
  }
  func.func @transform_9(%arg0: i32, %arg1: i32) -> (i32, i32) {
    %c0_i32 = arith.constant 0 : i32
    %c0_i32_0 = arith.constant 0 : i32
    return %arg0, %c0_i32 : i32, i32
  }
}

</mosaic_0001>

<bundles_post_ra>
// kernel: tpu_custom_call.1
= control target key start
LH: loop header
LB: loop body
LE: loop exit
PB: predicated region body
PF: predicated region fallthrough
CT: control target
= control target key end

     0   :  { %14 = vsyncpa [#allocation4], 0  ;;  %s1461_s0 = inlined_call_operand.vmem [shape: bf16[8,16], index: 0, kind: input, shape index: {}]   ;;  %s1462_s1 = inlined_call_operand.vmem [shape: bf16[16,32], index: 1, kind: input, shape index: {}]   ;;  %s1463_s2 = inlined_call_operand.hbm [shape: f32[1,32], index: 2, kind: input, shape index: {}]   ;;  %s1464_s3 = inlined_call_operand.hbm [shape: bf16[3,32,32], index: 3, kind: input, shape index: {}]   ;;  %s1465_s4 = inlined_call_operand.vmem [shape: f32[3,1,32], index: 4, kind: input, shape index: {}]   ;;  %s1466_s5 = inlined_call_operand.vmem [shape: bf16[32,128], index: 5, kind: input, shape index: {}]   ;;  %s1467_s6 = inlined_call_operand.vmem [shape: f32[1,128], index: 6, kind: input, shape index: {}]   ;;  %s1468_s7 = inlined_call_operand.vmem [shape: bf16[32,4], index: 7, kind: input, shape index: {}]   ;;  %s1469_s8 = inlined_call_operand.vmem [shape: bf16[4,32], index: 8, kind: input, shape index: {}]   ;;  %s1470_s9 = inlined_call_operand.hbm [shape: f32[8,128], index: 9, kind: output, shape index: {}]  }
   0x1   :  { %15 = vsyncpa [#allocation7], 0 }
   0x2   :  { %17 = vsyncpa [#allocation7 + $0x1], 0 }
   0x3   :  { %18 = vsyncpa [#allocation5], 0  ;;  %s1215_s30 = smov 0   ;;  %s1217_s10 = smov 0  }
   0x4   :  { %s1219_s11 = smov 0   ;;  %s1221_s12 = smov 0  }
   0x5   :  { %s1223_s13 = smov 0   ;;  %s1225_s14 = smov 0  }
   0x6 LB: > { %s1471_s15 = sadd.s32 4294967295, %s1152_s14   ;;  %p118_p0 = scmp.ne.s32.totalorder %s1140_s11, %s1136_s10  ;;  %s1152_s14 = sphi %s1225_s14, %s24_s14   ;;  %s1148_s13 = sphi %s1223_s13, %s1494_s13   ;;  %s1144_s12 = sphi %s1221_s12, %s1493_s12   ;;  %s1140_s11 = sphi %s1219_s11, %s1492_s11   ;;  %s1136_s10 = sphi %s1217_s10, %s1491_s10   ;;  %s1132_s30 = sphi %s1215_s30, %s1490_s30  }
   0x7   : > { %p119_p1 = scmp.eq.s32.totalorder %s1152_s14, 0  ;;  %p124_p2 = scmp.ne.s32.totalorder %s1136_s10, %s1132_s30 }
   0x8   : > { %p1251_p3 = scmp.eq.s32.totalorder %s1471_s15, 0  ;;  %p837_p5 = scmp.ge.s32.totalorder %s1152_s14, 1 }
   0x9   : > { %p120_p4 = por %p119_p1, %p118_p0  ;;  %p271_p7 = scmp.lt.s32.totalorder %s1152_s14, 4 }
   0xa   : > { %s1477_s17 = scalar_select %p1251_p3, 1, 0 }
   0xb   : > { %p1258_p6 = por %p1251_p3, %p124_p2  ;;  %p1263_p8 = pnand %p837_p5, %p271_p7 }
   0xc   : > { %s1154_s20 = smov [#allocation3]   ;;  %p937_p10 = scmp.lt.s32.totalorder %s1152_s14, 3 }
   0xd   : > { %s1478_s18 = scalar_select %p1258_p6, 1, 0 }
   0xe   : > { %s1479_s19 = scalar_select %p1263_p8, 1, 0 }
   0xf   : > { %s294_s21 = sshll.u32 %s1154_s20, 4  ;;  %p928_p9 = pneg %p1263_p8  ;;  %s295_s21 = int_to_ptr.vmem [resolvable:$true] %s294_s21 }
  0x10   : > { %s317_s22 = sand.u32 1, %s1140_s11   ;;  %p1277_p12 = pnand %p937_p10, %p120_p4 }
  0x11   : > { %p1273_p11 = pnand %p928_p9, %p1251_p3  ;;  %s1010_s27 = scalar_lea.hbm %s1463_s2, 16 }
  0x12   : > { %s1481_s24 = scalar_select %p1277_p12, 1, 0 }
  0x13   : > { %p1011_p13 = scmp.ne.s32.totalorder %s1463_s2, %s1010_s27  ;;  %p1012_p0 = pneg %p1273_p11 }
  0x14   : > { %p1017_p5 = scmp.lt.u32.totalorder %s1010_s27, %s1463_s2 }
  0x15   : > { %p1013_p1 = pnand %p1012_p0, %p1011_p13 }
  0x17   : > { %p1014_p2 = pneg %p1013_p1 }
  0x19   : > { %p1019_p4 = pnand %p1017_p5, %p1014_p2 }
  0x1b   : > { %1022 = shalt.err (!%p1019_p4)
}
  0x1c   : > { %s1023_s15 = scalar_lea.vmem %s295_s21, 16  ;;  %s1030_s25 = scalar_lea.vmem %s295_s21, 32 }
  0x1d   : > { %p1024_p7 = scmp.ne.s32.totalorder %s295_s21, %s1023_s15  ;;  %p1031_p6 = scmp.lt.s32.totalorder %s295_s21, %s295_s21 }
  0x1e   : > { %p1032_p3 = scmp.lt.s32.totalorder %s1030_s25, %s1023_s15 }
  0x1f   : > { %p1026_p9 = pnand %p1024_p7, %p1012_p0 }
  0x20   : > { %p1033_p8 = por %p1032_p3, %p1031_p6 }
  0x21   : > { %p1027_p10 = pneg %p1026_p9 }
  0x23   : > { %p1034_p12 = pnand %p1033_p8, %p1027_p10 }
  0x25   : > { %1037 = shalt.err (!%p1034_p12)
}
  0x26   : > { %931 = dma.hbm_to_vmem [thread:$0]  (!%p1273_p11), %s1463_s2, 16, %s295_s21, [#allocation4]  }
  0x27   : > { %s33_s27 = sadd.s32 1, %s1148_s13  ;;  %s841_s29 = sshll.u32 %s317_s22, 4 }
  0x28   : > { %p34_p13 = scmp.ge.s32.totalorder %s33_s27, 3  ;;  %s868_s15 = sshll.u32 %s1148_s13, 8 }
  0x29   : > { %s321_s30 = scalar_lea.vmem [#allocation6], %s841_s29  ;;  %s1306_s26 = scalar_lea.hbm %s1464_s3, %s868_s15 }
  0x2a   : > { %s328_s20 = sshll.u32 %s321_s30, 4  ;;  %s1496_s27 = smov (%p34_p13, %s33_s27), 0  ;;  %s1308_s20 = int_to_ptr.vmem [resolvable:$true] %s328_s20 }
  0x2b   : > { %s108_s21 = ssub.s32 %s1148_s13, %s1496_s27  ;;  %s1318_s29 = scalar_lea.sflag [#allocation7], %s317_s22 }
  0x2c   : > { %p1312_p3 = scmp.eq.s32.totalorder %s108_s21, 0  ;;  %s1038_s30 = scalar_lea.hbm %s1306_s26, 256 }
  0x2d   : > { %p1039_p6 = scmp.ne.s32.totalorder %s1306_s26, %s1038_s30  ;;  %p1483_p8 = scmp.ne.s32.totalorder %s1481_s24, 0 }
  0x2e   : > { %s1043_s25 = scalar_lea.hbm %s1464_s3, 768  ;;  %p1044_p1 = scmp.lt.u32.totalorder %s1306_s26, %s1464_s3 }
  0x2f   : > { %p1040_p11 = pneg %p1483_p8  ;;  %p1045_p2 = scmp.lt.u32.totalorder %s1043_s25, %s1038_s30 }
  0x30   : > { %p1047_p4 = scmp.lt.u32.totalorder %s1038_s30, %s1306_s26 }
  0x31   : > { %p1041_p12 = pnand %p1040_p11, %p1039_p6  ;;  %p1046_p5 = por %p1045_p2, %p1044_p1 }
  0x33   : > { %p1042_p0 = pneg %p1041_p12  ;;  %p1048_p7 = por %p1047_p4, %p1046_p5 }
  0x35   : > { %p1049_p9 = pnand %p1048_p7, %p1042_p0 }
  0x37   : > { %1052 = shalt.err (!%p1049_p9)
}
  0x38   : > { %s1053_s22 = scalar_lea.vmem %s1308_s20, 256  ;;  %s1155_s15 = smov [#allocation6]  }
  0x39   : > { %p1054_p10 = scmp.ne.s32.totalorder %s1308_s20, %s1053_s22  ;;  %s1058_s23 = sshll.u32 %s1155_s15, 4  ;;  %s1059_s23 = int_to_ptr.vmem [resolvable:$false] %s1058_s23 }
  0x3a   : > { %s1060_s16 = scalar_lea.vmem %s1059_s23, 512  ;;  %p1061_p12 = scmp.lt.s32.totalorder %s1308_s20, %s1059_s23 }
  0x3b   : > { %p1056_p13 = pnand %p1054_p10, %p1040_p11  ;;  %p1062_p1 = scmp.lt.s32.totalorder %s1060_s16, %s1053_s22 }
  0x3d   : > { %p1057_p6 = pneg %p1056_p13  ;;  %p1063_p2 = por %p1062_p1, %p1061_p12 }
  0x3f   : > { %p1064_p5 = pnand %p1063_p2, %p1057_p6 }
  0x41   : > { %1067 = shalt.err (!%p1064_p5)
}
  0x42   : > { %s1156_s30 = smov 64   ;;  %s1157_s25 = smov 4  }
  0x43   : > { %935 = dma.hbm_to_vmem [thread:$0]  (!%p1483_p8), %s1306_s26, 256, %s1308_s20, %s1318_s29, %s1156_s30, %s1156_s30, %s1157_s25  }
  0x44   : > { %s1484_s21 = sadd.s32 1, %s1140_s11  ;;  %p1485_p11 = scmp.ne.s32.totalorder %s1479_s19, 0 }
  0x45   : > { %s1351_s15 = scalar_select %p1312_p3, %s1140_s11, %s1484_s21  }
  0x46   : > { %346 = sbr.rel (%p1485_p11) target bundleno = 1374 (0x55e), region = 56  ;;  %p1486_p0 = scmp.ne.s32.totalorder (!%p1485_p11), %s1477_s17, 0 }
  0x4d   : > { %1119 = dma.done.wait (%p1486_p0), [#allocation4], 16  }
  0x4e   : > { %1121 = vsyncadd (%p1486_p0), [#allocation4], 4294967280  ;;  %s352_s22 = sand.u32 1, %s1136_s10   ;;  %p1487_p8 = scmp.ne.s32.totalorder %s1478_s18, 0 }
  0x4f   : > { %s1360_s23 = sshll.u32 %s352_s22, 4  ;;  %s353_s24 = scalar_lea.sflag [#allocation7], %s352_s22 }
  0x50   : > { %s356_s20 = scalar_lea.vmem [#allocation6], %s1360_s23 }
  0x51   : > { %1123 = dma.done.wait (%p1487_p8), %s353_s24, 256  }
  0x52   : > { %1125 = vsyncadd (%p1487_p8), %s353_s24, 4294967040  ;;  %p397_p3 = scmp.lt.s32.totalorder %s1144_s12, 2  ;;  %p847_p4 = scmp.ne.s32.totalorder %s1144_s12, 0 }
  0x53   : > { %v999_v0 = vld [vmem:[%s1462_s1] sm:$0xff] (!%p847_p4)   ;;  %v1158_v1 = vmov (!%p847_p4), 0.0   ;;  %vm1159_vm0 = vmmov (!%p847_p4), 0   ;;  %vm421_vm1 = vcmask (!%p847_p4), 130048   ;;  %v848_v3 = vld [vmem:[#allocation3] ss:$0 sm:$0xff] (!%p847_p4) }
  0x54   : > { %s1369_s19 = scalar_select %p397_p3, %s1144_s12, 2 }
  0x55   : > { %404 = sbr.rel (%p847_p4) target bundleno = 306 (0x132), region = 68  ;;  %882 = vmatprep.subr.bf16.mxu0 (!%p847_p4), %v1158_v1  ;;  %884 = vmatprep.mubr.msk.bf16.mxu0 (!%p847_p4), %vm1159_vm0, %v1158_v1  ;;  %v405_v2 = vld [vmem:[%s1461_s0] sm:$0xf] (!%p847_p4)  ;;  %vm466_vm2 = vcmask (!%p847_p4), 261120  }
  0x56   : > { %s399_s28 = scalar_lea.vmem %s1465_s4, %s1369_s19  ;;  %883 = vmatpush3.bf16.msra.mxu0 (!%p847_p4), %v999_v0 }
  0x59   : > { %885 = vmatmul.mubr.msk.bf16.vlgmr.msra.gmra.mrb[0].mxu0 (!%p847_p4), %vm421_vm1, %v405_v2 }
 0x12c   : > { %v459_v4 = vpop.f32.mrb[0].mxu0 }
 0x12d   : > { %v460_v5 = vadd.f32 %v848_v3, %v459_v4  ;;  %v886_v6 = vpop.f32.mrb[1].mxu0 }
 0x12e   : > { %v462_v7 = vpop.f32.mrb[2].mxu0 }
 0x12f   : > { %v465_v8 = vmax.f32 %v460_v5, 0.0  ;;  %v887_v9 = vpop.f32.mrb[3].mxu0 }
 0x131   : > { %467 = vst.msk [vmem:[#allocation2] sm:$0xff] %vm466_vm2, %v465_v8 }
 0x132 PF: > { %v1000_v10 = vld [vmem:[%s356_s20] sm:$0xff]   ;;  %v1160_v11 = vmov 0.0   ;;  %v1001_v12 = vld [vmem:[%s356_s20 + $0x8] sm:$0xff]   ;;  %vm1161_vm3 = vmmov 0   ;;  %vm493_vm4 = vcmask 261120   ;;  %vm611_vm5 = vcmask 1041408  }
 0x133   : > { %888 = vmatprep.subr.bf16.mxu0 %v1160_v11  ;;  %896 = vmatprep.subr.bf16.mxu1 %v1160_v11  ;;  %v851_v15 = vld [vmem:[%s399_s28] ss:$0 sm:$0xff]  ;;  %v1003_v23 = vld [vmem:[%s1468_s7 + $0x8] sm:$0xff]   ;;  %vm607_vm6 = vcmask 31744   ;;  %p859_p7 = scmp.ne.s32.totalorder %s1144_s12, 2 }
 0x134   : > { %889 = vmatpush3.bf16.msra.mxu0 %v1000_v10  ;;  %892 = vmatprep.mubr.msk.bf16.mxu0 %vm1161_vm3, %v1160_v11  ;;  %v1002_v22 = vld [vmem:[%s1468_s7] sm:$0xff]   ;;  %v1162_v45 = vmov (!%p859_p7), 0.0   ;;  %v1009_v46 = vld [vmem:[%s1466_s5 + $0x8] sm:$0xff] (!%p859_p7)   ;;  %vm1163_vm7 = vmmov (!%p859_p7), 0  }
 0x135   : > { %890 = vmatprep.subr.bf16.mxu0 %v1160_v11  ;;  %900 = vmatprep.mubr.msk.bf16.mxu1 %vm1161_vm3, %v1160_v11  ;;  %v606_v29 = vld [vmem:[%s1469_s8] sm:$0x3] }
 0x136   : > { %897 = vmatpush3.bf16.msra.mxu1 %v1002_v22  ;;  %v613_v30 = vsel %vm611_vm5, %v606_v29, 0  ;;  %v1008_v44 = vld [vmem:[%s1466_s5] sm:$0xff] (!%p859_p7)  }
 0x137   : > { %898 = vmatprep.subr.bf16.mxu1 %v1160_v11  ;;  %v860_v48 = vld [vmem:[%s1467_s6] ss:$0 sm:$0xff] (!%p859_p7) }
 0x138   : > { %v468_v13 = vld [vmem:[#allocation2] sm:$0xff]  ;;  %891 = vmatpush3.bf16.msra.mxu0 %v1001_v12 }
 0x139   : > { %v469_v14 = vpack.c.bf16 %v468_v13, %v468_v13  ;;  %904 = vmatprep.subr.bf16.mxu0 %v1160_v11 }
 0x13a   : > { %899 = vmatpush3.bf16.msra.mxu1 %v1003_v23 }
 0x13b   : > { %893 = vmatmul.mubr.msk.bf16.vlgmr.msra.gmra.mrb[0].mxu0 %vm493_vm4, %v469_v14 }
 0x13c   : > { %906 = vmatprep.mubr.msk.bf16.mxu0 %vm1161_vm3, %v1160_v11  ;;  %905 = vmatpush3.bf16.msra.mxu0 %v613_v30 }
 0x13d   : > { %910 = vmatprep.subr.bf16.mxu0 (!%p859_p7), %v1162_v45 }
 0x20e   : > { %v531_v16 = vpop.f32.mrb[0].mxu0 }
 0x20f   : > { %v532_v17 = vadd.f32 %v851_v15, %v531_v16  ;;  %v894_v18 = vpop.f32.mrb[1].mxu0 }
 0x210   : > { %v534_v19 = vpop.f32.mrb[2].mxu0 }
 0x211   : > { %v895_v20 = vpop.f32.mrb[3].mxu0  ;;  %v537_v21 = vsel %vm493_vm4, %v532_v17, -inf }
 0x212   : > { %538 = vmax.xlane.f32.xlu0 %v537_v21 }
 0x29f   : > { %v539_v24 = vpop.xlane.xlu0 %538 }
 0x2a0   : > { %v540_v25 = vsub.f32 %v532_v17, %v539_v24 }
 0x2a2   : > { %v541_v26 = vmul.f32 1.442695, %v540_v25 }
 0x2a4   : > { %1004 = vpow2.f32 %v541_v26 }
 0x2ae   : > { %v1005_v27 = vpop.eup %1004 }
 0x2af   : > { %v543_v28 = vpack.c.bf16 %v1005_v27, %v1005_v27 }
 0x2b1   : > { %901 = vmatmul.mubr.msk.bf16.vlgmr.msra.gmra.mrb[0].mxu1 %vm493_vm4, %v543_v28 }
 0x384   : > { %v597_v31 = vpop.f32.mrb[0].mxu1 }
 0x385   : > { %v603_v32 = vmax.f32 %v597_v31, 1e-30  ;;  %v902_v33 = vpop.f32.mrb[1].mxu1 }
 0x386   : > { %v600_v34 = vpop.f32.mrb[2].mxu1 }
 0x387   : > { %1006 = vrcp.f32 %v603_v32  ;;  %v903_v35 = vpop.f32.mrb[3].mxu1 }
 0x391   : > { %v1007_v36 = vpop.eup %1006 }
 0x392   : > { %v605_v37 = vpack.c.bf16 %v1007_v36, %v1007_v36 }
 0x394   : > { %907 = vmatmul.mubr.msk.bf16.vlgmr.msra.gmra.mrb[4].mxu0 %vm607_vm6, %v605_v37 }
 0x395   : > { %911 = vmatpush3.bf16.msra.mxu0 (!%p859_p7), %v1008_v44  ;;  %914 = vmatprep.mubr.msk.bf16.mxu0 (!%p859_p7), %vm1163_vm7, %v1162_v45 }
 0x396   : > { %912 = vmatprep.subr.bf16.mxu0 (!%p859_p7), %v1162_v45 }
 0x399   : > { %913 = vmatpush3.bf16.msra.mxu0 (!%p859_p7), %v1009_v46 }
 0x466   : > { %661 = sbr.rel (%p859_p7) target bundleno = 1349 (0x545), region = 72 }
 0x467   : > { %v649_v38 = vpop.f32.mrb[4].mxu0 }
 0x468   : > { %v655_v39 = vmul.f32 %v1005_v27, %v649_v38  ;;  %v908_v40 = vpop.f32.mrb[5].mxu0 }
 0x469   : > { %v652_v41 = vpop.f32.mrb[6].mxu0 }
 0x46a   : > { %v656_v42 = vadd.f32 %v655_v39, %v468_v13  ;;  %v909_v43 = vpop.f32.mrb[7].mxu0 }
 0x46c   : > { %657 = vst.msk [vmem:[#allocation2] sm:$0xff] %vm493_vm4, %v656_v42  ;;  %v662_v47 = vpack.c.bf16 (!%p859_p7), %v656_v42, %v656_v42 }
 0x46e   : > { %915 = vmatmul.mubr.msk.bf16.vlgmr.msra.gmra.mrb[0].mxu0 %vm493_vm4, %v662_v47 }
 0x541   : > { %v723_v49 = vpop.f32.mrb[0].mxu0 }
 0x542   : > { %v724_v50 = vadd.f32 %v860_v48, %v723_v49  ;;  %v916_v51 = vpop.f32.mrb[1].mxu0 }
 0x543   : > { %v726_v52 = vpop.f32.mrb[2].mxu0 }
 0x544   : > { %729 = vst [vmem:[#allocation8] sm:$0xff] %v724_v50  ;;  %v917_v53 = vpop.f32.mrb[3].mxu0 }
 0x545 PF: > { %s1488_s30 = sadd.s32 4294967295, %s1152_s14   ;;  %s1164_s21 = smov [#allocation8]  }
 0x546   : > { %p1417_p9 = scmp.eq.s32.totalorder %s1488_s30, 2  ;;  %s739_s22 = sshll.u32 %s1164_s21, 4  ;;  %s740_s22 = int_to_ptr.vmem [resolvable:$true] %s739_s22 }
 0x547   : > { %s1068_s23 = scalar_lea.vmem %s740_s22, 128  ;;  %p1075_p12 = scmp.lt.s32.totalorder %s740_s22, %s740_s22 }
 0x548   : > { %p1069_p10 = scmp.ne.s32.totalorder %s740_s22, %s1068_s23  ;;  %p1076_p1 = scmp.lt.s32.totalorder %s1068_s23, %s1068_s23 }
 0x54a   : > { %p1070_p13 = pnand %p1069_p10, %p1417_p9  ;;  %p1077_p2 = por %p1076_p1, %p1075_p12 }
 0x54c   : > { %p1071_p6 = pneg %p1070_p13 }
 0x54e   : > { %p1078_p5 = pnand %p1077_p2, %p1071_p6 }
 0x550   : > { %1081 = shalt.err (!%p1078_p5)
}
 0x551   : > { %s1082_s19 = scalar_lea.hbm %s1470_s9, 128 }
 0x552   : > { %p1083_p11 = scmp.ne.s32.totalorder %s1470_s9, %s1082_s19  ;;  %p1088_p3 = scmp.lt.u32.totalorder %s1082_s19, %s1470_s9 }
 0x554   : > { %p1084_p0 = pnand %p1083_p11, %p1417_p9 }
 0x556   : > { %p1085_p8 = pneg %p1084_p0 }
 0x558   : > { %p1090_p4 = pnand %p1088_p3, %p1085_p8 }
 0x55a   : > { %1093 = shalt.err (!%p1090_p4)
}
 0x55b   : > { %925 = dma.vmem_to_hbm [thread:$0]  (%p1417_p9), %s740_s22, 128, %s1470_s9, [#allocation5]  }
 0x55c   : > { %1127 = dma.done.wait (%p1417_p9), [#allocation5], 128  }
 0x55d   : > { %1129 = vsyncadd (%p1417_p9), [#allocation5], 4294967168 }
 0x55e PF: > { %s24_s14 = sadd.s32 1, %s1152_s14   ;;  %s1490_s30 = smov %s1136_s10 }
 0x55f   : > { %p21_p7 = scmp.ge.s32.totalorder %s24_s14, 5   ;;  %s1491_s10 = smov %s1140_s11 }
 0x560   : > { %s1492_s11 = smov %s1351_s15  ;;  %s1493_s12 = smov %s1148_s13 }
 0x561   : > { %s1494_s13 = smov %s1496_s27  ;;  %23 = sbr.rel (!%p21_p7) target bundleno = 6 (0x6), region = 113 }
 0x568   :  { %752 = vsyncpa [#allocation4], 1 }
 0x569   :  { %754 = vsyncpa [#allocation4 + $0x1], 1 }
 0x56a   :  { %755 = vsyncpa [#allocation7], 1 }
 0x56b   :  { %757 = vsyncpa [#allocation7 + $0x1], 1 }
 0x56c   :  { %758 = vsyncpa [#allocation5], 1 }
 0x56d   :  { %760 = vsyncpa [#allocation5 + $0x1], 1 }

</bundles_post_ra>
